<compile_context>
chip_gen: v5e
topology: v5e:2x2
jax: 0.10.0
libtpu: 0.0.40
codegen_flags: <defaults>
</compile_context>

<pallas_src>
import functools

import jax
import jax.numpy as jnp
from jax.experimental import pallas as pl
from jax.experimental.pallas import tpu as pltpu


def _round_up(x, m):
    return ((x + m - 1) // m) * m


def _physical_vmem_bytes():
    """Per-core VMEM capacity; conservative fallback covers v7x (64 MiB)."""
    try:
        return int(pltpu.get_tpu_info().vmem_capacity_bytes)
    except Exception:
        return 64 * 1024 * 1024


def _plan_tiling(n, f_pad, g_pad, tile_n):
    """Pick tile size / padding, decide adjacency residency, size the VMEM limit."""
    np_base = _round_up(n, 128)
    budget = _physical_vmem_bytes() - 8 * 1024 * 1024      # headroom

    tile = min(_round_up(max(tile_n, 128), 128), np_base)
    while True:
        np_pad = _round_up(np_base, tile)
        need = (2 * (tile * tile * 2)        # adjacency tile, double-buffered (bf16)
                + 2 * (tile * f_pad * 2)     # x0 tile (bf16)
                + 2 * (f_pad * f_pad * 2)    # weight slab (bf16)
                + 2 * (f_pad * 4)            # bias row (f32)
                + 2 * (g_pad * tile * 4)     # pool columns (f32)
                + 2 * (g_pad * f_pad * 4)    # resident pooled output (f32)
                + tile * f_pad * 4           # f32 accumulator scratch
                + 2 * np_pad * f_pad * 2)    # activation ping-pong (bf16)
        padding_ok = (np_pad - np_base) * 8 <= np_base
        if (need <= budget and padding_ok) or tile <= 128:
            break
        tile = max(128, _round_up(tile // 2, 128))

    adj_bytes = np_pad * np_pad * 2
    adj_resident = (need + adj_bytes) <= budget
    total = need + (adj_bytes if adj_resident else 0)
    vmem_limit = int(min(max(total + 4 * 1024 * 1024, 32 * 1024 * 1024), budget))
    return tile, np_pad, adj_resident, vmem_limit


# ------------------------------ fused Pallas kernel ------------------------------

def _fused_gnn_kernel(adj_ref, x0_ref, w_ref, b_ref, p_ref, out_ref,
                      acc_ref, act_ref, *opt_scratch,
                      tm, tk, np_pad, adj_resident):
    l = pl.program_id(0)          # layer index
    i = pl.program_id(1)          # output-row tile of A_hat
    k = pl.program_id(2)          # reduction (source node) tile, innermost
    n_layers = pl.num_programs(0)
    n_k = pl.num_programs(2)

    # Zero the resident pooled-output block once, at the very first grid step.
    @pl.when((l == 0) & (i == 0) & (k == 0))
    def _init_out():
        out_ref[...] = jnp.zeros_like(out_ref)

    # Stage raw node features into ping-pong buffer 1 (the read buffer of layer 0).
    @pl.when((l == 0) & (i == 0))
    def _stage_x0():
        base = pl.multiple_of(np_pad + k * tk, tk)
        act_ref[pl.ds(base, tk), :] = x0_ref[...]

    # Adjacency tile: stream from HBM; if it fits, pin it in a resident VMEM slab
    # during layer 0 and serve layers >= 1 from VMEM (adjacency BlockSpec index
    # is frozen for l >= 1 so HBM is only read once).
    if adj_resident:
        adj_vmem, = opt_scratch
        slot = i * n_k + k

        @pl.when(l == 0)
        def _stage_adj():
            adj_vmem[slot] = adj_ref[...]

        a_tile = adj_vmem[slot]
    else:
        a_tile = adj_ref[...]

    # acc = / += A_hat[i_tile, k_tile] @ X_prev[k_tile, :]   (bf16 x bf16 -> f32 MXU)
    read_base = pl.multiple_of(((l + 1) % 2) * np_pad + k * tk, tk)
    xs = act_ref[pl.ds(read_base, tk), :]
    prod = jnp.dot(a_tile, xs, preferred_element_type=jnp.float32)

    @pl.when(k == 0)
    def _acc_first():
        acc_ref[...] = prod

    @pl.when(k > 0)
    def _acc_rest():
        acc_ref[...] += prod

    # Finalize this row tile: (A @ X) @ W + b, relu for next layer, pool at last.
    @pl.when(k == n_k - 1)
    def _finalize():
        h = jnp.dot(acc_ref[...].astype(jnp.bfloat16), w_ref[0],
                    preferred_element_type=jnp.float32) + b_ref[0]

        # relu'd copy feeds the next layer; the last layer's copy is never read,
        # so skip the store entirely (jk_mode=None -> no activation after last conv).
        @pl.when(l < n_layers - 1)
        def _store_act():
            write_base = pl.multiple_of((l % 2) * np_pad + i * tm, tm)
            act_ref[pl.ds(write_base, tm), :] = (
                jnp.maximum(h, 0.0).astype(act_ref.dtype))

        @pl.when(l == n_layers - 1)
        def _pool():
            # global_mean_pool fused in: out += P[:, i_tile] @ h (lane-dense out).
            out_ref[...] += jnp.dot(p_ref[...], h,
                                    preferred_element_type=jnp.float32)


def fused_gcn_forward(adj_p, x_p, w_stack, b_stack, pool_p, *, tm, tk,
                      adj_resident, vmem_limit):
    """adj_p [Np,Np] bf16, x_p [Np,Fp] bf16, w_stack [L,Fp,Fp] bf16,
    b_stack [L,1,Fp] f32, pool_p [Gp,Np] f32  ->  [Gp, Fp] f32 pooled output."""
    np_pad = adj_p.shape[0]
    n_layers, f_pad, _ = w_stack.shape
    g_pad = pool_p.shape[0]
    m_tiles = np_pad // tm
    k_tiles = np_pad // tk

    adj_passes = 1 if adj_resident else n_layers
    flops = int(2 * n_layers * np_pad * np_pad * f_pad
                + 2 * n_layers * np_pad * f_pad * f_pad
                + 2 * g_pad * np_pad * f_pad)
    bytes_accessed = int(adj_passes * np_pad * np_pad * 2 + np_pad * f_pad * 2
                         + n_layers * f_pad * f_pad * 2 + n_layers * f_pad * 4
                         + g_pad * np_pad * 4 + g_pad * f_pad * 4)

    if adj_resident:
        # Adjacency is read from HBM only during layer 0; freeze the block index
        # for l >= 1 so the pipeline stops re-streaming it.
        adj_map = lambda l, i, k: (jnp.where(l == 0, i, 0), jnp.where(l == 0, k, 0))
    else:
        adj_map = lambda l, i, k: (i, k)

    # x0 only advances while it is actually being staged (layer 0, row tile 0).
    x0_map = lambda l, i, k: (jnp.where((l == 0) & (i == 0), k, 0), 0)
    # Pool matrix is only consumed at the last layer.
    pool_map = lambda l, i, k: (0, jnp.where(l == n_layers - 1, i, 0))

    scratch_shapes = [
        pltpu.VMEM((tm, f_pad), jnp.float32),            # f32 accumulator
        pltpu.VMEM((2 * np_pad, f_pad), jnp.bfloat16),   # activation ping-pong
    ]
    if adj_resident:
        scratch_shapes.append(
            pltpu.VMEM((m_tiles * k_tiles, tm, tk), jnp.bfloat16))  # resident A_hat

    kernel = functools.partial(_fused_gnn_kernel, tm=tm, tk=tk, np_pad=np_pad,
                               adj_resident=adj_resident)

    return pl.pallas_call(
        kernel,
        out_shape=jax.ShapeDtypeStruct((g_pad, f_pad), jnp.float32),
        grid_spec=pltpu.PrefetchScalarGridSpec(
            num_scalar_prefetch=0,
            grid=(n_layers, m_tiles, k_tiles),
            in_specs=[
                # adjacency tile (bf16)
                pl.BlockSpec((tm, tk), adj_map),
                # input features (bf16)
                pl.BlockSpec((tk, f_pad), x0_map),
                # per-layer padded weight slab (bf16, re-DMA'd only when l changes)
                pl.BlockSpec((1, f_pad, f_pad), lambda l, i, k: (l, 0, 0)),
                # per-layer bias row (f32)
                pl.BlockSpec((1, 1, f_pad), lambda l, i, k: (l, 0, 0)),
                # mean-pool matrix columns (f32), advanced only on the last layer
                pl.BlockSpec((g_pad, tm), pool_map),
            ],
            out_specs=pl.BlockSpec((g_pad, f_pad), lambda l, i, k: (0, 0)),
            scratch_shapes=scratch_shapes),
        compiler_params=pltpu.CompilerParams(
            dimension_semantics=("arbitrary", "arbitrary", "arbitrary"),
            vmem_limit_bytes=vmem_limit),
        cost_estimate=pl.CostEstimate(flops=flops, transcendentals=0,
                                      bytes_accessed=bytes_accessed),
    )(adj_p, x_p, w_stack, b_stack, pool_p)


# --------------------------------- glue (JAX) ------------------------------------

def build_norm_adj(edge_index, num_nodes, improved=False):
    """Dense A_hat = D^-1/2 (A + self_loops) D^-1/2 with PyG
    add_remaining_self_loops semantics: existing self-loops keep weight 1,
    nodes without a self-loop get `fill` (2 if improved else 1)."""
    src, dst = edge_index[0], edge_index[1]
    fill = 2.0 if improved else 1.0
    is_self = (src == dst)
    w = jnp.where(is_self, 0.0, 1.0)                         # drop explicit self-loops
    adj = jnp.zeros((num_nodes, num_nodes), jnp.float32).at[dst, src].add(w)
    has_self = jnp.zeros((num_nodes,), jnp.float32).at[src].max(
        is_self.astype(jnp.float32))
    diag = jnp.where(has_self > 0, 1.0, fill)
    adj = adj + jnp.diag(diag)
    deg = jnp.sum(adj, axis=1)
    dinv = jnp.where(deg > 0, jax.lax.rsqrt(deg), 0.0)
    return dinv[:, None] * adj * dinv[None, :]


def build_pool_matrix(batch, num_graphs, num_nodes):
    """P[g, n] = 1/|nodes in g| if batch[n] == g else 0  (global_mean_pool)."""
    onehot = (batch[None, :] == jnp.arange(num_graphs)[:, None]).astype(jnp.float32)
    counts = jnp.sum(onehot, axis=1, keepdims=True)
    return onehot / jnp.maximum(counts, 1.0)


@functools.partial(jax.jit, static_argnames=("num_graphs", "improved", "tile_n"))
def gnn_forward(x, edge_index, batch, weights, biases, *,
                num_graphs, improved, tile_n=1024):
    n, f_in = x.shape
    n_layers = len(weights)
    out_channels = weights[-1].shape[1]

    f_pad = _round_up(max(max([f_in] + [w.shape[1] for w in weights]), 128), 128)
    g_pad = _round_up(max(num_graphs, 8), 8)

    tile, np_pad, adj_resident, vmem_limit = _plan_tiling(n, f_pad, g_pad, tile_n)

    adj = build_norm_adj(edge_index, n, improved=improved)
    adj_p = jnp.zeros((np_pad, np_pad), jnp.bfloat16).at[:n, :n].set(
        adj.astype(jnp.bfloat16))
    x_p = jnp.zeros((np_pad, f_pad), jnp.bfloat16).at[:n, :f_in].set(
        x.astype(jnp.bfloat16))

    w_stack = jnp.zeros((n_layers, f_pad, f_pad), jnp.float32)
    b_stack = jnp.zeros((n_layers, 1, f_pad), jnp.float32)
    for l, (w, b) in enumerate(zip(weights, biases)):
        fi, fo = w.shape
        w_stack = w_stack.at[l, :fi, :fo].set(w)
        b_stack = b_stack.at[l, 0, :fo].set(b.reshape(-1))
    w_stack = w_stack.astype(jnp.bfloat16)        # bf16 weights, f32 MXU accumulate

    pool = build_pool_matrix(batch, num_graphs, n)
    pool_p = jnp.zeros((g_pad, np_pad), jnp.float32).at[:num_graphs, :n].set(pool)

    out_p = fused_gcn_forward(adj_p, x_p, w_stack, b_stack, pool_p,
                              tm=tile, tk=tile,
                              adj_resident=adj_resident, vmem_limit=vmem_limit)
    return out_p[:num_graphs, :out_channels]


class BasicGNNPallas:
    """Mirror of BasicGNN.__init__ (GCNConv instantiation, jk=None, norm=None)."""

    def __init__(self, model_params, key):
        self.in_channels = model_params["MODEL_FEAT_SIZE"]
        self.hidden_channels = model_params["MODEL_EMBEDDING_SIZE"]
        self.num_layers = model_params["MODEL_NUM_LAYERS"]
        self.out_channels = 1
        self.dropout = model_params["MODEL_DROPOUT_RATE"]   # eval mode -> identity
        self.improved = bool(model_params["MODEL_GCN_IMPROVED"])

        dims = []
        ic = self.in_channels
        if self.num_layers > 1:
            dims.append((ic, self.hidden_channels))
            ic = self.hidden_channels
        for _ in range(self.num_layers - 2):
            dims.append((ic, self.hidden_channels))
            ic = self.hidden_channels
        dims.append((ic, self.out_channels))                 # jk=None -> conv to out

        weights, biases = [], []
        for fi, fo in dims:
            key, kw, kb = jax.random.split(key, 3)
            scale = 1.0 / float(fi) ** 0.5
            w = (jax.random.uniform(kw, (fi, fo), jnp.float32) * 2.0 - 1.0) * scale
            b = (jax.random.uniform(kb, (1, fo), jnp.float32) * 2.0 - 1.0) * 0.1
            weights.append(w)
            biases.append(b)
        self.weights = tuple(weights)
        self.biases = tuple(biases)

    def forward(self, x, edge_index, batch, num_graphs):
        return gnn_forward(x, edge_index, batch, self.weights, self.biases,
                           num_graphs=num_graphs, improved=self.improved)


def _reference_forward(x, edge_index, batch, weights, biases, num_graphs, improved):
    """Pure-JAX f32 reference (same math, no Pallas) for a sanity check."""
    n = x.shape[0]
    adj = build_norm_adj(edge_index, n, improved=improved)
    h = x
    n_layers = len(weights)
    for idx in range(n_layers):
        h = adj @ (h @ weights[idx]) + biases[idx]
        if idx < n_layers - 1:
            h = jnp.maximum(h, 0.0)
    pool = build_pool_matrix(batch, num_graphs, n)
    return pool @ h


# ------------------------------------ main ---------------------------------------

if __name__ == "__main__":
    model_params = {
        "MODEL_FEAT_SIZE": 16,
        "MODEL_EMBEDDING_SIZE": 32,
        "MODEL_NUM_LAYERS": 3,
        "MODEL_DROPOUT_RATE": 0.2,
        "MODEL_EDGE_DIM": 4,        # unused by the GCN instantiation
        "MODEL_NUM_TIMESTEPS": 2,   # unused
        "MODEL_NUM_HEADS": 1,       # unused
        "MODEL_ATT_V2": False,      # unused
        "MODEL_GCN_IMPROVED": False,
    }

    key = jax.random.PRNGKey(0)
    k_model, k_x, k_e = jax.random.split(key, 3)

    num_nodes = 16
    num_edges = 40
    num_graphs = 2

    x = jax.random.normal(k_x, (num_nodes, model_params["MODEL_FEAT_SIZE"]),
                          jnp.float32)
    edge_index = jax.random.randint(k_e, (2, num_edges), 0, num_nodes,
                                    dtype=jnp.int32)
    batch = jnp.concatenate([jnp.zeros(num_nodes // 2, jnp.int32),
                             jnp.ones(num_nodes - num_nodes // 2, jnp.int32)])

    model = BasicGNNPallas(model_params, k_model)
    out = model.forward(x, edge_index, batch, num_graphs)
    out = jax.block_until_ready(out)
    assert out.shape == (num_graphs, 1)

    ref = _reference_forward(x, edge_index, batch, model.weights, model.biases,
                             num_graphs, model.improved)
    err = float(jnp.max(jnp.abs(out - ref)))
    assert err < 5e-2, f"kernel mismatch vs reference: max|diff|={err}"

    print("KERNEL_OK")
</pallas_src>

<mosaic_0001>
module attributes {stable_mosaic.version = 11 : i64} {
  func.func @_fused_gnn_kernel(%arg0: i32, %arg1: i32, %arg2: i32, %arg3: memref<128x128xbf16, #tpu.memory_space<vmem>>, %arg4: memref<128x128xbf16, #tpu.memory_space<vmem>>, %arg5: memref<1x128x128xbf16, #tpu.memory_space<vmem>>, %arg6: memref<1x1x128xf32, #tpu.memory_space<vmem>>, %arg7: memref<8x128xf32, #tpu.memory_space<vmem>>, %arg8: memref<8x128xf32, #tpu.memory_space<vmem>>, %arg9: memref<128x128xf32, #tpu.memory_space<vmem>>, %arg10: memref<256x128xbf16, #tpu.memory_space<vmem>>, %arg11: memref<1x128x128xbf16, #tpu.memory_space<vmem>>) attributes {dimension_semantics = [#tpu.dimension_semantics<arbitrary>, #tpu.dimension_semantics<arbitrary>, #tpu.dimension_semantics<arbitrary>], iteration_bounds = array<i64: 3, 1, 1>, scalar_prefetch = 0 : i64, scratch_operands = 3 : i64, tpu.core_type = #tpu.core_type<tc>, window_params = [{transform_indices = @transform_0, window_bounds = array<i64: 128, 128>}, {transform_indices = @transform_1, window_bounds = array<i64: 128, 128>}, {transform_indices = @transform_2, window_bounds = array<i64: 1, 128, 128>}, {transform_indices = @transform_3, window_bounds = array<i64: 1, 1, 128>}, {transform_indices = @transform_4, window_bounds = array<i64: 8, 128>}, {pipeline_mode = #tpu.pipeline_mode<synchronous>, transform_indices = @transform_5, window_bounds = array<i64: 8, 128>}]} {
    %c0_i32 = arith.constant 0 : i32
    %0 = arith.cmpi eq, %arg0, %c0_i32 : i32
    %c0_i32_0 = arith.constant 0 : i32
    %1 = arith.cmpi eq, %arg1, %c0_i32_0 : i32
    %2 = arith.andi %0, %1 : i1
    %c0_i32_1 = arith.constant 0 : i32
    %3 = arith.cmpi eq, %arg2, %c0_i32_1 : i32
    %4 = arith.andi %2, %3 : i1
    %5 = arith.extui %4 : i1 to i32
    %c0_i32_2 = arith.constant 0 : i32
    %6 = arith.cmpi ne, %5, %c0_i32_2 : i32
    scf.if %6 {
      %cst_23 = arith.constant 0.000000e+00 : f32
      %47 = vector.broadcast %cst_23 : f32 to vector<8x128xf32>
      %c0_24 = arith.constant 0 : index
      %c0_25 = arith.constant 0 : index
      %48 = vector.load %arg8[%c0_24, %c0_25] : memref<8x128xf32, #tpu.memory_space<vmem>>, vector<8x128xf32>
      tpu.vector_store %arg8[%c0_24, %c0_25], %47 {strides = array<i32>} : memref<8x128xf32, #tpu.memory_space<vmem>>, vector<8x128xf32>,
    } else {
    }
    %c0_i32_3 = arith.constant 0 : i32
    %7 = arith.cmpi eq, %arg0, %c0_i32_3 : i32
    %c0_i32_4 = arith.constant 0 : i32
    %8 = arith.cmpi eq, %arg1, %c0_i32_4 : i32
    %9 = arith.andi %7, %8 : i1
    %10 = arith.extui %9 : i1 to i32
    %c0_i32_5 = arith.constant 0 : i32
    %11 = arith.cmpi ne, %10, %c0_i32_5 : i32
    scf.if %11 {
      %c128_i32_23 = arith.constant 128 : i32
      %47 = arith.muli %arg2, %c128_i32_23 : i32
      %c128_i32_24 = arith.constant 128 : i32
      %48 = arith.addi %c128_i32_24, %47 : i32
      %49 = tpu.assume_multiple %48, 128 : i32
      %c0_25 = arith.constant 0 : index
      %c0_26 = arith.constant 0 : index
      %50 = vector.load %arg4[%c0_25, %c0_26] : memref<128x128xbf16, #tpu.memory_space<vmem>>, vector<128x128xbf16>
      %51 = arith.index_cast %49 : i32 to index
      %c0_27 = arith.constant 0 : index
      %52 = vector.load %arg10[%51, %c0_27] : memref<256x128xbf16, #tpu.memory_space<vmem>>, vector<128x128xbf16>
      tpu.vector_store %arg10[%51, %c0_27], %50 {strides = array<i32>} : memref<256x128xbf16, #tpu.memory_space<vmem>>, vector<128x128xbf16>,
    } else {
    }
    %c1_i32 = arith.constant 1 : i32
    %12 = arith.muli %arg1, %c1_i32 : i32
    %13 = arith.addi %12, %arg2 : i32
    %c0_i32_6 = arith.constant 0 : i32
    %14 = arith.cmpi eq, %arg0, %c0_i32_6 : i32
    %15 = arith.extui %14 : i1 to i32
    %c0_i32_7 = arith.constant 0 : i32
    %16 = arith.cmpi ne, %15, %c0_i32_7 : i32
    scf.if %16 {
      %c0_23 = arith.constant 0 : index
      %c0_24 = arith.constant 0 : index
      %47 = vector.load %arg3[%c0_23, %c0_24] : memref<128x128xbf16, #tpu.memory_space<vmem>>, vector<128x128xbf16>
      %48 = arith.index_cast %13 : i32 to index
      %c0_25 = arith.constant 0 : index
      %c0_26 = arith.constant 0 : index
      %49 = vector.load %arg11[%48, %c0_25, %c0_26] : memref<1x128x128xbf16, #tpu.memory_space<vmem>>, vector<1x128x128xbf16>
      %50 = vector.shape_cast %49 : vector<1x128x128xbf16> to vector<128x128xbf16>
      %51 = vector.shape_cast %47 : vector<128x128xbf16> to vector<1x128x128xbf16>
      tpu.vector_store %arg11[%48, %c0_25, %c0_26], %51 {strides = array<i32>} : memref<1x128x128xbf16, #tpu.memory_space<vmem>>, vector<1x128x128xbf16>,
    } else {
    }
    %17 = arith.index_cast %13 : i32 to index
    %c0 = arith.constant 0 : index
    %c0_8 = arith.constant 0 : index
    %18 = vector.load %arg11[%17, %c0, %c0_8] : memref<1x128x128xbf16, #tpu.memory_space<vmem>>, vector<1x128x128xbf16>
    %19 = vector.shape_cast %18 : vector<1x128x128xbf16> to vector<128x128xbf16>
    %c1_i32_9 = arith.constant 1 : i32
    %20 = arith.addi %arg0, %c1_i32_9 : i32
    %c2_i32 = arith.constant 2 : i32
    %c0_i32_10 = arith.constant 0 : i32
    %21 = arith.cmpi eq, %c2_i32, %c0_i32_10 : i32
    %c1_i32_11 = arith.constant 1 : i32
    %22 = arith.select %21, %c1_i32_11, %c2_i32 : i32
    %23 = arith.remsi %20, %22 : i32
    %c0_i32_12 = arith.constant 0 : i32
    %24 = arith.cmpi ne, %23, %c0_i32_12 : i32
    %c0_i32_13 = arith.constant 0 : i32
    %25 = arith.cmpi slt, %23, %c0_i32_13 : i32
    %c0_i32_14 = arith.constant 0 : i32
    %26 = arith.cmpi slt, %22, %c0_i32_14 : i32
    %27 = arith.xori %25, %26 : i1
    %28 = arith.andi %27, %24 : i1
    %29 = arith.addi %23, %22 : i32
    %30 = arith.select %28, %29, %23 : i32
    %c128_i32 = arith.constant 128 : i32
    %31 = arith.muli %30, %c128_i32 : i32
    %c128_i32_15 = arith.constant 128 : i32
    %32 = arith.muli %arg2, %c128_i32_15 : i32
    %33 = arith.addi %31, %32 : i32
    %34 = tpu.assume_multiple %33, 128 : i32
    %35 = arith.index_cast %34 : i32 to index
    %c0_16 = arith.constant 0 : index
    %36 = vector.load %arg10[%35, %c0_16] : memref<256x128xbf16, #tpu.memory_space<vmem>>, vector<128x128xbf16>
    %cst = arith.constant dense<0.000000e+00> : vector<128x128xf32>
    %37 = tpu.matmul %19, %36, %cst {dimension_numbers = #tpu.dot_dimension_numbers<[1], [0], [0], [1], [0, 0, 1, 1], [], []>} : vector<128x128xbf16>, vector<128x128xbf16>, vector<128x128xf32> -> vector<128x128xf32>
    %c0_i32_17 = arith.constant 0 : i32
    %38 = arith.cmpi eq, %arg2, %c0_i32_17 : i32
    %39 = arith.extui %38 : i1 to i32
    %c0_i32_18 = arith.constant 0 : i32
    %40 = arith.cmpi ne, %39, %c0_i32_18 : i32
    scf.if %40 {
      %c0_23 = arith.constant 0 : index
      %c0_24 = arith.constant 0 : index
      %47 = vector.load %arg9[%c0_23, %c0_24] : memref<128x128xf32, #tpu.memory_space<vmem>>, vector<128x128xf32>
      tpu.vector_store %arg9[%c0_23, %c0_24], %37 {strides = array<i32>} : memref<128x128xf32, #tpu.memory_space<vmem>>, vector<128x128xf32>,
    } else {
    }
    %c0_i32_19 = arith.constant 0 : i32
    %41 = arith.cmpi sgt, %arg2, %c0_i32_19 : i32
    %42 = arith.extui %41 : i1 to i32
    %c0_i32_20 = arith.constant 0 : i32
    %43 = arith.cmpi ne, %42, %c0_i32_20 : i32
    scf.if %43 {
      %c0_23 = arith.constant 0 : index
      %c0_24 = arith.constant 0 : index
      %47 = vector.load %arg9[%c0_23, %c0_24] : memref<128x128xf32, #tpu.memory_space<vmem>>, vector<128x128xf32>
      %48 = arith.addf %47, %37 : vector<128x128xf32>
      %c0_25 = arith.constant 0 : index
      %c0_26 = arith.constant 0 : index
      %49 = vector.load %arg9[%c0_25, %c0_26] : memref<128x128xf32, #tpu.memory_space<vmem>>, vector<128x128xf32>
      tpu.vector_store %arg9[%c0_25, %c0_26], %48 {strides = array<i32>} : memref<128x128xf32, #tpu.memory_space<vmem>>, vector<128x128xf32>,
    } else {
    }
    %c0_i32_21 = arith.constant 0 : i32
    %44 = arith.cmpi eq, %arg2, %c0_i32_21 : i32
    %45 = arith.extui %44 : i1 to i32
    %c0_i32_22 = arith.constant 0 : i32
    %46 = arith.cmpi ne, %45, %c0_i32_22 : i32
    scf.if %46 {
      %c0_23 = arith.constant 0 : index
      %c0_24 = arith.constant 0 : index
      %47 = vector.load %arg9[%c0_23, %c0_24] : memref<128x128xf32, #tpu.memory_space<vmem>>, vector<128x128xf32>
      %48 = arith.truncf %47 : vector<128x128xf32> to vector<128x128xbf16>
      %c0_25 = arith.constant 0 : index
      %c0_26 = arith.constant 0 : index
      %c0_27 = arith.constant 0 : index
      %49 = vector.load %arg5[%c0_25, %c0_26, %c0_27] : memref<1x128x128xbf16, #tpu.memory_space<vmem>>, vector<1x128x128xbf16>
      %50 = vector.shape_cast %49 : vector<1x128x128xbf16> to vector<128x128xbf16>
      %cst_28 = arith.constant dense<0.000000e+00> : vector<128x128xf32>
      %51 = tpu.matmul %48, %50, %cst_28 {dimension_numbers = #tpu.dot_dimension_numbers<[1], [0], [0], [1], [0, 0, 1, 1], [], []>} : vector<128x128xbf16>, vector<128x128xbf16>, vector<128x128xf32> -> vector<128x128xf32>
      %c0_29 = arith.constant 0 : index
      %c0_30 = arith.constant 0 : index
      %c0_31 = arith.constant 0 : index
      %52 = vector.load %arg6[%c0_29, %c0_30, %c0_31] : memref<1x1x128xf32, #tpu.memory_space<vmem>>, vector<1x1x128xf32>
      %53 = vector.shape_cast %52 : vector<1x1x128xf32> to vector<1x128xf32>
      %54 = vector.broadcast %53 : vector<1x128xf32> to vector<128x128xf32>
      %55 = arith.addf %51, %54 : vector<128x128xf32>
      %c2_i32_32 = arith.constant 2 : i32
      %56 = arith.cmpi slt, %arg0, %c2_i32_32 : i32
      %57 = arith.extui %56 : i1 to i32
      %c0_i32_33 = arith.constant 0 : i32
      %58 = arith.cmpi ne, %57, %c0_i32_33 : i32
      scf.if %58 {
        %c2_i32_36 = arith.constant 2 : i32
        %c0_i32_37 = arith.constant 0 : i32
        %62 = arith.cmpi eq, %c2_i32_36, %c0_i32_37 : i32
        %c1_i32_38 = arith.constant 1 : i32
        %63 = arith.select %62, %c1_i32_38, %c2_i32_36 : i32
        %64 = arith.remsi %arg0, %63 : i32
        %c0_i32_39 = arith.constant 0 : i32
        %65 = arith.cmpi ne, %64, %c0_i32_39 : i32
        %c0_i32_40 = arith.constant 0 : i32
        %66 = arith.cmpi slt, %64, %c0_i32_40 : i32
        %c0_i32_41 = arith.constant 0 : i32
        %67 = arith.cmpi slt, %63, %c0_i32_41 : i32
        %68 = arith.xori %66, %67 : i1
        %69 = arith.andi %68, %65 : i1
        %70 = arith.addi %64, %63 : i32
        %71 = arith.select %69, %70, %64 : i32
        %c128_i32_42 = arith.constant 128 : i32
        %72 = arith.muli %71, %c128_i32_42 : i32
        %c128_i32_43 = arith.constant 128 : i32
        %73 = arith.muli %arg1, %c128_i32_43 : i32
        %74 = arith.addi %72, %73 : i32
        %75 = tpu.assume_multiple %74, 128 : i32
        %cst_44 = arith.constant 0.000000e+00 : f32
        %76 = vector.broadcast %cst_44 : f32 to vector<128x128xf32>
        %77 = arith.maximumf %55, %76 : vector<128x128xf32>
        %78 = arith.truncf %77 : vector<128x128xf32> to vector<128x128xbf16>
        %79 = arith.index_cast %75 : i32 to index
        %c0_45 = arith.constant 0 : index
        %80 = vector.load %arg10[%79, %c0_45] : memref<256x128xbf16, #tpu.memory_space<vmem>>, vector<128x128xbf16>
        tpu.vector_store %arg10[%79, %c0_45], %78 {strides = array<i32>} : memref<256x128xbf16, #tpu.memory_space<vmem>>, vector<128x128xbf16>,
      } else {
      }
      %c2_i32_34 = arith.constant 2 : i32
      %59 = arith.cmpi eq, %arg0, %c2_i32_34 : i32
      %60 = arith.extui %59 : i1 to i32
      %c0_i32_35 = arith.constant 0 : i32
      %61 = arith.cmpi ne, %60, %c0_i32_35 : i32
      scf.if %61 {
        %c0_36 = arith.constant 0 : index
        %c0_37 = arith.constant 0 : index
        %62 = vector.load %arg8[%c0_36, %c0_37] : memref<8x128xf32, #tpu.memory_space<vmem>>, vector<8x128xf32>
        %c0_38 = arith.constant 0 : index
        %c0_39 = arith.constant 0 : index
        %63 = vector.load %arg7[%c0_38, %c0_39] : memref<8x128xf32, #tpu.memory_space<vmem>>, vector<8x128xf32>
        %cst_40 = arith.constant dense<0.000000e+00> : vector<8x128xf32>
        %64 = tpu.matmul %63, %55, %cst_40 {dimension_numbers = #tpu.dot_dimension_numbers<[1], [0], [0], [1], [0, 0, 1, 1], [], []>} : vector<8x128xf32>, vector<128x128xf32>, vector<8x128xf32> -> vector<8x128xf32>
        %65 = arith.addf %62, %64 : vector<8x128xf32>
        %c0_41 = arith.constant 0 : index
        %c0_42 = arith.constant 0 : index
        %66 = vector.load %arg8[%c0_41, %c0_42] : memref<8x128xf32, #tpu.memory_space<vmem>>, vector<8x128xf32>
        tpu.vector_store %arg8[%c0_41, %c0_42], %65 {strides = array<i32>} : memref<8x128xf32, #tpu.memory_space<vmem>>, vector<8x128xf32>,
      } else {
      }
    } else {
    }
    return
  }
  func.func @transform_0(%arg0: i32, %arg1: i32, %arg2: i32) -> (i32, i32) {
    %c0_i32 = arith.constant 0 : i32
    %0 = arith.cmpi eq, %arg0, %c0_i32 : i32
    %c0_i32_0 = arith.constant 0 : i32
    %1 = arith.select %0, %arg1, %c0_i32_0 : i32
    %c0_i32_1 = arith.constant 0 : i32
    %2 = arith.cmpi eq, %arg0, %c0_i32_1 : i32
    %c0_i32_2 = arith.constant 0 : i32
    %3 = arith.select %2, %arg2, %c0_i32_2 : i32
    %c0_i32_3 = arith.constant 0 : i32
    return %1, %3 : i32, i32
  }
  func.func @transform_1(%arg0: i32, %arg1: i32, %arg2: i32) -> (i32, i32) {
    %c0_i32 = arith.constant 0 : i32
    %0 = arith.cmpi eq, %arg0, %c0_i32 : i32
    %c0_i32_0 = arith.constant 0 : i32
    %1 = arith.cmpi eq, %arg1, %c0_i32_0 : i32
    %2 = arith.andi %0, %1 : i1
    %c0_i32_1 = arith.constant 0 : i32
    %3 = arith.select %2, %arg2, %c0_i32_1 : i32
    %c0_i32_2 = arith.constant 0 : i32
    %c0_i32_3 = arith.constant 0 : i32
    return %3, %c0_i32_2 : i32, i32
  }
  func.func @transform_2(%arg0: i32, %arg1: i32, %arg2: i32) -> (i32, i32, i32) {
    %c0_i32 = arith.constant 0 : i32
    %c0_i32_0 = arith.constant 0 : i32
    %c0_i32_1 = arith.constant 0 : i32
    return %arg0, %c0_i32, %c0_i32_0 : i32, i32, i32
  }
  func.func @transform_3(%arg0: i32, %arg1: i32, %arg2: i32) -> (i32, i32, i32) {
    %c0_i32 = arith.constant 0 : i32
    %c0_i32_0 = arith.constant 0 : i32
    %c0_i32_1 = arith.constant 0 : i32
    return %arg0, %c0_i32, %c0_i32_0 : i32, i32, i32
  }
  func.func @transform_4(%arg0: i32, %arg1: i32, %arg2: i32) -> (i32, i32) {
    %c2_i32 = arith.constant 2 : i32
    %0 = arith.cmpi eq, %arg0, %c2_i32 : i32
    %c0_i32 = arith.constant 0 : i32
    %1 = arith.select %0, %arg1, %c0_i32 : i32
    %c0_i32_0 = arith.constant 0 : i32
    %c0_i32_1 = arith.constant 0 : i32
    return %c0_i32_0, %1 : i32, i32
  }
  func.func @transform_5(%arg0: i32, %arg1: i32, %arg2: i32) -> (i32, i32) {
    %c0_i32 = arith.constant 0 : i32
    %c0_i32_0 = arith.constant 0 : i32
    %c0_i32_1 = arith.constant 0 : i32
    return %c0_i32, %c0_i32_0 : i32, i32
  }
}

</mosaic_0001>

<bundles_post_ra>
// kernel: gnn_forward.1
= control target key start
LH: loop header
LB: loop body
LE: loop exit
PB: predicated region body
PF: predicated region fallthrough
CT: control target
= control target key end

     0   :  { %s1402_s18 = smov 0   ;;  %s1404_s19 = smov 0   ;;  %s1574_s0 = inlined_call_operand.vmem [shape: bf16[128,128], index: 0, kind: input, shape index: {}]   ;;  %s1575_s1 = inlined_call_operand.vmem [shape: bf16[128,128], index: 1, kind: input, shape index: {}]   ;;  %s1576_s2 = inlined_call_operand.vmem [shape: bf16[3,128,128], index: 2, kind: input, shape index: {}]   ;;  %s1577_s3 = inlined_call_operand.vmem [shape: f32[3,1,128], index: 3, kind: input, shape index: {}]   ;;  %s1578_s4 = inlined_call_operand.vmem [shape: f32[8,128], index: 4, kind: input, shape index: {}]   ;;  %s1579_s5 = inlined_call_operand.vmem [shape: f32[8,128], index: 5, kind: output, shape index: {}]  }
   0x1   :  { %s1406_s20 = smov 0  }
   0x2 LB: > { %s34_s21 = sadd.s32 1, %s1365_s19  ;;  %p1095_p0 = scmp.ge.s32.totalorder %s1369_s20, 1  ;;  %s1369_s20 = sphi %s1406_s20, %s15_s20   ;;  %s1365_s19 = sphi %s1404_s19, %s1581_s19   ;;  %s1361_s18 = sphi %s1402_s18, %s1580_s18  }
   0x3   : > { %p36_p1 = scmp.ge.s32.totalorder %s34_s21, 3  ;;  %p285_p2 = scmp.lt.s32.totalorder %s1369_s20, 4 }
   0x5   : > { %s1583_s21 = smov (%p36_p1, %s34_s21), 0  ;;  %p286_p3 = pnand %p1095_p0, %p285_p2 }
   0x6   : > { %p369_p4 = scmp.lt.s32.totalorder (!%p286_p3), %s1361_s18, 2  ;;  %p385_p5 = scmp.eq.s32.totalorder (!%p286_p3), %s1361_s18, 0 }
   0x7   : > { %289 = sbr.rel (%p286_p3) target bundleno = 602 (0x25a), region = 40 }
   0xc   : > { %s1425_s22 = scalar_select %p369_p4, %s1361_s18, 2  ;;  %v1371_v0 = vmov (%p385_p5), 0.0  }
   0xd   : > { %393 = sbr.rel (!%p385_p5) target bundleno = 18 (0x12), region = 44  ;;  %394 = vst [vmem:[%s1579_s5] sm:$0xff] (%p385_p5), %v1371_v0 }
   0xe   : > { %s1231_s23 = sshll.u32 %s1425_s22, 6  ;;  %s376_s26 = scalar_lea.vmem %s1577_s3, %s1425_s22 }
   0xf   : > { %s1435_s29 = scalar_lea.vmem %s1576_s2, %s1231_s23 }
  0x12 PF: > { %396 = sbr.rel (!%p385_p5) target bundleno = 27 (0x1b), region = 48  ;;  %v399_v1 = vld [vmem:[%s1575_s1] sm:$0xff] (%p385_p5)   ;;  %v401_v2 = vld [vmem:[%s1575_s1 + $0x8] sm:$0xff] (%p385_p5)   ;;  %v403_v3 = vld [vmem:[%s1575_s1 + $0x10] sm:$0xff] (%p385_p5)  }
  0x13   : > { %1101 = vst [vmem:[#allocation3 + $0x40] sm:$0xff] (%p385_p5), %v399_v1   ;;  %v405_v4 = vld [vmem:[%s1575_s1 + $0x18] sm:$0xff] (%p385_p5)   ;;  %v407_v5 = vld [vmem:[%s1575_s1 + $0x20] sm:$0xff] (%p385_p5)   ;;  %v409_v6 = vld [vmem:[%s1575_s1 + $0x28] sm:$0xff] (%p385_p5)  }
  0x14   : > { %1103 = vst [vmem:[#allocation3 + $0x48] sm:$0xff] (%p385_p5), %v401_v2   ;;  %v411_v7 = vld [vmem:[%s1575_s1 + $0x30] sm:$0xff] (%p385_p5)   ;;  %v413_v8 = vld [vmem:[%s1575_s1 + $0x38] sm:$0xff] (%p385_p5)  }
  0x15   : > { %1105 = vst [vmem:[#allocation3 + $0x50] sm:$0xff] (%p385_p5), %v403_v3  }
  0x16   : > { %1107 = vst [vmem:[#allocation3 + $0x58] sm:$0xff] (%p385_p5), %v405_v4  }
  0x17   : > { %1109 = vst [vmem:[#allocation3 + $0x60] sm:$0xff] %v407_v5  }
  0x18   : > { %1111 = vst [vmem:[#allocation3 + $0x68] sm:$0xff] %v409_v6  }
  0x19   : > { %1113 = vst [vmem:[#allocation3 + $0x70] sm:$0xff] %v411_v7  }
  0x1a   : > { %1115 = vst [vmem:[#allocation3 + $0x78] sm:$0xff] %v413_v8  }
  0x1b PF: > { %p1117_p6 = scmp.ne.s32.totalorder %s1361_s18, 0 }
  0x1d   : > { %438 = sbr.rel (%p1117_p6) target bundleno = 43 (0x2b), region = 52 }
  0x22   : > { %v439_v9 = vld [vmem:[%s1574_s0] sm:$0xff]   ;;  %v441_v10 = vld [vmem:[%s1574_s0 + $0x8] sm:$0xff]   ;;  %v443_v11 = vld [vmem:[%s1574_s0 + $0x10] sm:$0xff]  }
  0x23   : > { %458 = vst [vmem:[#allocation4] sm:$0xff] %v439_v9   ;;  %v445_v12 = vld [vmem:[%s1574_s0 + $0x18] sm:$0xff]   ;;  %v447_v13 = vld [vmem:[%s1574_s0 + $0x20] sm:$0xff]   ;;  %v449_v14 = vld [vmem:[%s1574_s0 + $0x28] sm:$0xff]  }
  0x24   : > { %460 = vst [vmem:[#allocation4 + $0x8] sm:$0xff] %v441_v10   ;;  %v451_v15 = vld [vmem:[%s1574_s0 + $0x30] sm:$0xff]   ;;  %v453_v16 = vld [vmem:[%s1574_s0 + $0x38] sm:$0xff]  }
  0x25   : > { %462 = vst [vmem:[#allocation4 + $0x10] sm:$0xff] %v443_v11  }
  0x26   : > { %464 = vst [vmem:[#allocation4 + $0x18] sm:$0xff] %v445_v12  }
  0x27   : > { %466 = vst [vmem:[#allocation4 + $0x20] sm:$0xff] %v447_v13  }
  0x28   : > { %468 = vst [vmem:[#allocation4 + $0x28] sm:$0xff] %v449_v14  }
  0x29   : > { %470 = vst [vmem:[#allocation4 + $0x30] sm:$0xff] %v451_v15  }
  0x2a   : > { %472 = vst [vmem:[#allocation4 + $0x38] sm:$0xff] %v453_v16  }
  0x2b PF: > { %s493_s27 = sadd.s32 1, %s1361_s18  ;;  %v1234_v25 = vld [vmem:[#allocation4] sm:$0xff]  ;;  %v1235_v27 = vld [vmem:[#allocation4 + $0x8] sm:$0xff]  ;;  %v1257_v29 = vld [vmem:[%s1435_s29 + $0x38] sm:$0xff]  ;;  %p1219_p9 = scmp.ge.s32.totalorder %s1361_s18, 2 }
  0x2c   : > { %p494_p7 = scmp.lt.s32.totalorder %s493_s27, 0  ;;  %s495_s28 = ssub.s32 0, %s493_s27  ;;  %840 = vmatpush.bf16.msra.mxu1 %v1257_v29  ;;  %v1256_v30 = vld [vmem:[%s1435_s29 + $0x30] sm:$0xff]  ;;  %1313 = vmatpush.bf16.msra.mxu3 %v1257_v29  ;;  %v1255_v31 = vld [vmem:[%s1435_s29 + $0x28] sm:$0xff]  ;;  %v1254_v32 = vld [vmem:[%s1435_s29 + $0x20] sm:$0xff] }
  0x2d   : > { %s1118_s30 = smin.u32 %s495_s28, %s493_s27  ;;  %v1236_v33 = vld [vmem:[#allocation4 + $0x10] sm:$0xff]  ;;  %v1253_v35 = vld [vmem:[%s1435_s29 + $0x18] sm:$0xff]  ;;  %v1251_v39 = vld [vmem:[%s1435_s29 + $0x8] sm:$0xff]  ;;  %p893_p10 = scmp.lt.s32.totalorder (!%p1219_p9), %s1361_s18, 0 }
  0x2e   : > { %s497_s6 = sand.u32 1, %s1118_s30   ;;  %v1238_v26 = vld [vmem:[#allocation4 + $0x20] sm:$0xff]  ;;  %v1237_v36 = vld [vmem:[#allocation4 + $0x18] sm:$0xff]  ;;  %v1252_v38 = vld [vmem:[%s1435_s29 + $0x10] sm:$0xff]  ;;  %s894_s22 = ssub.s32 (!%p1219_p9), 0, %s1361_s18 }
  0x2f   : > { %s498_s7 = ssub.s32 0, %s497_s6  ;;  %v1239_v28 = vld [vmem:[#allocation4 + $0x28] sm:$0xff]  ;;  %v1250_v40 = vld [vmem:[%s1435_s29] sm:$0xff] }
  0x30   : > { %s1585_s7 = smov (!%p494_p7, %s498_s7), %s497_s6  ;;  %841 = vmatpush.bf16.msra.mxu1 %v1256_v30  ;;  %1314 = vmatpush.bf16.msra.mxu3 %v1256_v30  ;;  %v1240_v34 = vld [vmem:[#allocation4 + $0x30] sm:$0xff]  ;;  %v1346_v1 = vld [vmem:[%s376_s26] ss:$0 sm:$0xff]  ;;  %s1220_s26 = smin.u32 (!%p1219_p9), %s1361_s18, %s894_s22 }
  0x31   : > { %p1120_p8 = scmp.lt.s32.totalorder %s1585_s7, 0  ;;  %s504_s8 = sadd.s32 2, %s1585_s7  ;;  %v1241_v37 = vld [vmem:[#allocation4 + $0x38] sm:$0xff] }
  0x32   : > { %s896_s14 = sand.u32 (!%p1219_p9), 1, %s1220_s26  }
  0x33   : > { %s1587_s8 = smov (!%p1120_p8, %s504_s8), %s1585_s7  ;;  %s897_s15 = ssub.s32 (!%p1219_p9), 0, %s896_s14 }
  0x34   : > { %s1121_s9 = sshll.u32 %s1587_s8, 7  ;;  %842 = vmatpush.bf16.msra.mxu1 %v1255_v31  ;;  %1315 = vmatpush.bf16.msra.mxu3 %v1255_v31 }
  0x35   : > { %s509_s10 = sshra.s32 %s1121_s9, 3 }
  0x36   : > { %s1122_s11 = sshll.u32 %s509_s10, 2 }
  0x37   : > { %s512_s12 = scalar_lea.vmem [#allocation3], %s1122_s11 }
  0x38   : > { %v1249_v17 = vld [vmem:[%s512_s12 + $0x38] sm:$0xff]  ;;  %v1248_v18 = vld [vmem:[%s512_s12 + $0x30] sm:$0xff]  ;;  %v1247_v19 = vld [vmem:[%s512_s12 + $0x28] sm:$0xff]  ;;  %843 = vmatpush.bf16.msra.mxu1 %v1254_v32  ;;  %1316 = vmatpush.bf16.msra.mxu3 %v1254_v32 }
  0x39   : > { %625 = vmatpush.bf16.msra.mxu0 %v1249_v17  ;;  %1305 = vmatpush.bf16.msra.mxu2 %v1249_v17  ;;  %v1246_v20 = vld [vmem:[%s512_s12 + $0x20] sm:$0xff]  ;;  %v1245_v21 = vld [vmem:[%s512_s12 + $0x18] sm:$0xff]  ;;  %v1244_v22 = vld [vmem:[%s512_s12 + $0x10] sm:$0xff] }
  0x3a   : > { %v1243_v23 = vld [vmem:[%s512_s12 + $0x8] sm:$0xff]  ;;  %v1242_v24 = vld [vmem:[%s512_s12] sm:$0xff] }
  0x3c   : > { %844 = vmatpush.bf16.msra.mxu1 %v1253_v35  ;;  %1317 = vmatpush.bf16.msra.mxu3 %v1253_v35 }
  0x3d   : > { %626 = vmatpush.bf16.msra.mxu0 %v1248_v18  ;;  %1306 = vmatpush.bf16.msra.mxu2 %v1248_v18 }
  0x40   : > { %845 = vmatpush.bf16.msra.mxu1 %v1252_v38  ;;  %1318 = vmatpush.bf16.msra.mxu3 %v1252_v38 }
  0x41   : > { %627 = vmatpush.bf16.msra.mxu0 %v1247_v19  ;;  %1307 = vmatpush.bf16.msra.mxu2 %v1247_v19 }
  0x44   : > { %846 = vmatpush.bf16.msra.mxu1 %v1251_v39  ;;  %1319 = vmatpush.bf16.msra.mxu3 %v1251_v39 }
  0x45   : > { %628 = vmatpush.bf16.msra.mxu0 %v1246_v20  ;;  %1308 = vmatpush.bf16.msra.mxu2 %v1246_v20 }
  0x48   : > { %847 = vmatpush.bf16.msra.mxu1 %v1250_v40  ;;  %1320 = vmatpush.bf16.msra.mxu3 %v1250_v40 }
  0x49   : > { %629 = vmatpush.bf16.msra.mxu0 %v1245_v21  ;;  %1309 = vmatpush.bf16.msra.mxu2 %v1245_v21 }
  0x4d   : > { %630 = vmatpush.bf16.msra.mxu0 %v1244_v22  ;;  %1310 = vmatpush.bf16.msra.mxu2 %v1244_v22 }
  0x51   : > { %631 = vmatpush.bf16.msra.mxu0 %v1243_v23  ;;  %1311 = vmatpush.bf16.msra.mxu2 %v1243_v23 }
  0x55   : > { %632 = vmatpush.bf16.msra.mxu0 %v1242_v24  ;;  %1312 = vmatpush.bf16.msra.mxu2 %v1242_v24 }
  0x58   : > { %633 = vmatmul.bf16.vlgmr.msra.gmra.mxu0 %v1234_v25  ;;  %653 = vmatmul.bf16.vlgmr.msra.gmra.mxu2 %v1238_v26 }
  0x68   : > { %638 = vmatmul.bf16.gmra.mxu0 %v1235_v27  ;;  %658 = vmatmul.bf16.gmra.mxu2 %v1239_v28 }
  0x78   : > { %643 = vmatmul.bf16.gmra.mxu0 %v1236_v33  ;;  %663 = vmatmul.bf16.gmra.mxu2 %v1240_v34 }
  0x88   : > { %648 = vmatmul.bf16.gmra.mxu0 %v1237_v36  ;;  %668 = vmatmul.bf16.gmra.mxu2 %v1241_v37 }
  0xd5   : > { %v634_v41 = vpop.f32.mrf.mxu0 }
  0xdb   : > { %v654_v42 = vpop.f32.mrf.mxu2 }
  0xdd   : > { %v636_v43 = vpop.f32.mrf.mxu0 }
  0xde   : > { %v764_v44 = vpack.c.bf16 %v636_v43, %v634_v41 }
  0xe0   : > { %848 = vmatmul.bf16.vlgmr.msra.gmra.mxu1 %v764_v44 }
  0xe3   : > { %v656_v45 = vpop.f32.mrf.mxu2 }
  0xe4   : > { %v768_v46 = vpack.c.bf16 %v656_v45, %v654_v42 }
  0xe5   : > { %v639_v47 = vpop.f32.mrf.mxu0 }
  0xe6   : > { %868 = vmatmul.bf16.vlgmr.msra.gmra.mxu3 %v768_v46 }
  0xeb   : > { %v659_v48 = vpop.f32.mrf.mxu2 }
  0xed   : > { %v641_v49 = vpop.f32.mrf.mxu0 }
  0xee   : > { %v765_v50 = vpack.c.bf16 %v641_v49, %v639_v47 }
  0xf0   : > { %853 = vmatmul.bf16.gmra.mxu1 %v765_v50 }
  0xf3   : > { %v661_v51 = vpop.f32.mrf.mxu2 }
  0xf4   : > { %v769_v52 = vpack.c.bf16 %v661_v51, %v659_v48 }
  0xf5   : > { %v644_v53 = vpop.f32.mrf.mxu0 }
  0xf6   : > { %873 = vmatmul.bf16.gmra.mxu3 %v769_v52 }
  0xfb   : > { %v664_v54 = vpop.f32.mrf.mxu2 }
  0xfd   : > { %v646_v55 = vpop.f32.mrf.mxu0 }
  0xfe   : > { %v766_v56 = vpack.c.bf16 %v646_v55, %v644_v53 }
 0x100   : > { %858 = vmatmul.bf16.gmra.mxu1 %v766_v56 }
 0x103   : > { %v666_v57 = vpop.f32.mrf.mxu2 }
 0x104   : > { %v770_v58 = vpack.c.bf16 %v666_v57, %v664_v54 }
 0x105   : > { %v649_v59 = vpop.f32.mrf.mxu0 }
 0x106   : > { %878 = vmatmul.bf16.gmra.mxu3 %v770_v58 }
 0x10b   : > { %v669_v60 = vpop.f32.mrf.mxu2 }
 0x10d   : > { %v651_v61 = vpop.f32.mrf.mxu0 }
 0x10e   : > { %v767_v62 = vpack.c.bf16 %v651_v61, %v649_v59 }
 0x110   : > { %863 = vmatmul.bf16.gmra.mxu1 %v767_v62 }
 0x113   : > { %v671_v63 = vpop.f32.mrf.mxu2 }
 0x114   : > { %v771_v0 = vpack.c.bf16 %v671_v63, %v669_v60 }
 0x116   : > { %883 = vmatmul.bf16.gmra.mxu3 %v771_v0 }
 0x15d   : > { %v849_v2 = vpop.f32.mrf.mxu1 }
 0x15e   : > { %v1503_v3 = vadd.f32 %v1346_v1, %v849_v2 }
 0x165   : > { %v851_v4 = vpop.f32.mrf.mxu1 }
 0x166   : > { %v1505_v5 = vadd.f32 %v1346_v1, %v851_v4 }
 0x169   : > { %v869_v6 = vpop.f32.mrf.mxu3 }
 0x16a   : > { %v1507_v7 = vadd.f32 %v1346_v1, %v869_v6 }
 0x16d   : > { %v854_v8 = vpop.f32.mrf.mxu1 }
 0x16e   : > { %v1509_v9 = vadd.f32 %v1346_v1, %v854_v8 }
 0x171   : > { %v871_v10 = vpop.f32.mrf.mxu3 }
 0x172   : > { %v1511_v11 = vadd.f32 %v1346_v1, %v871_v10 }
 0x175   : > { %v856_v12 = vpop.f32.mrf.mxu1 }
 0x176   : > { %v1513_v13 = vadd.f32 %v1346_v1, %v856_v12 }
 0x179   : > { %v874_v14 = vpop.f32.mrf.mxu3 }
 0x17a   : > { %v1515_v15 = vadd.f32 %v1346_v1, %v874_v14 }
 0x17d   : > { %v859_v16 = vpop.f32.mrf.mxu1 }
 0x17e   : > { %v1517_v17 = vadd.f32 %v1346_v1, %v859_v16 }
 0x181   : > { %v876_v18 = vpop.f32.mrf.mxu3 }
 0x182   : > { %v1519_v19 = vadd.f32 %v1346_v1, %v876_v18 }
 0x185   : > { %v861_v20 = vpop.f32.mrf.mxu1 }
 0x186   : > { %v1521_v21 = vadd.f32 %v1346_v1, %v861_v20 }
 0x189   : > { %v879_v22 = vpop.f32.mrf.mxu3 }
 0x18a   : > { %v1523_v23 = vadd.f32 %v1346_v1, %v879_v22 }
 0x18d   : > { %v864_v24 = vpop.f32.mrf.mxu1 }
 0x18e   : > { %v1525_v25 = vadd.f32 %v1346_v1, %v864_v24 }
 0x191   : > { %v881_v26 = vpop.f32.mrf.mxu3 }
 0x192   : > { %v882_v27 = vadd.f32 %v1346_v1, %v881_v26 }
 0x195   : > { %v866_v28 = vpop.f32.mrf.mxu1 }
 0x196   : > { %v867_v29 = vadd.f32 %v1346_v1, %v866_v28 }
 0x199   : > { %v884_v30 = vpop.f32.mrf.mxu3 }
 0x19a   : > { %v885_v31 = vadd.f32 %v1346_v1, %v884_v30 }
 0x19e   : > { %892 = sbr.rel (%p1219_p9) target bundleno = 435 (0x1b3), region = 68 }
 0x1a1   : > { %v886_v32 = vpop.f32.mrf.mxu3 }
 0x1a2   : > { %v887_v33 = vadd.f32 %v1346_v1, %v886_v32 }
 0x1a3   : > { %s1589_s15 = smov (!%p893_p10, %s897_s15), %s896_s14  ;;  %v908_v34 = vmax.f32 %v1503_v3, 0.0  ;;  %v909_v35 = vmax.f32 %v1505_v5, 0.0  ;;  %v910_v36 = vmax.f32 %v1509_v9, 0.0  ;;  %v911_v37 = vmax.f32 %v1513_v13, 0.0 }
 0x1a4   : > { %p1222_p11 = scmp.lt.s32.totalorder %s1589_s15, 0  ;;  %s903_s16 = sadd.s32 2, %s1589_s15  ;;  %v912_v38 = vmax.f32 %v1517_v17, 0.0  ;;  %v913_v39 = vmax.f32 %v1521_v21, 0.0  ;;  %v914_v40 = vmax.f32 %v1525_v25, 0.0  ;;  %v915_v41 = vmax.f32 %v867_v29, 0.0 }
 0x1a5   : > { %v1261_v42 = vpack.c.bf16 %v909_v35, %v908_v34  ;;  %v916_v43 = vmax.f32 %v1507_v7, 0.0  ;;  %v917_v44 = vmax.f32 %v1511_v11, 0.0  ;;  %v1266_v45 = vpack.c.bf16 %v911_v37, %v910_v36 }
 0x1a6   : > { %s1591_s16 = smov (!%p1222_p11, %s903_s16), %s1589_s15  ;;  %v918_v46 = vmax.f32 %v1515_v15, 0.0  ;;  %v919_v47 = vmax.f32 %v1519_v19, 0.0  ;;  %v1271_v48 = vpack.c.bf16 %v913_v39, %v912_v38  ;;  %v920_v49 = vmax.f32 %v1523_v23, 0.0 }
 0x1a7   : > { %s1223_s17 = sshll.u32 %s1591_s16, 7  ;;  %v921_v50 = vmax.f32 %v882_v27, 0.0  ;;  %v1276_v51 = vpack.c.bf16 %v915_v41, %v914_v40  ;;  %v922_v52 = vmax.f32 %v885_v31, 0.0  ;;  %v923_v53 = vmax.f32 %v887_v33, 0.0 }
 0x1a8   : > { %s940_s23 = sshra.s32 %s1223_s17, 3  ;;  %v1281_v54 = vpack.c.bf16 %v917_v44, %v916_v43  ;;  %v1286_v55 = vpack.c.bf16 %v919_v47, %v918_v46 }
 0x1a9   : > { %s1224_s24 = sshll.u32 %s940_s23, 2  ;;  %v1291_v56 = vpack.c.bf16 %v921_v50, %v920_v49  ;;  %v1296_v57 = vpack.c.bf16 %v923_v53, %v922_v52 }
 0x1aa   : > { %s943_s25 = scalar_lea.vmem [#allocation3], %s1224_s24 }
 0x1ab   : > { %1262 = vst [vmem:[%s943_s25] sm:$0xff] %v1261_v42  }
 0x1ac   : > { %1298 = vst [vmem:[%s943_s25 + $0x8] sm:$0xff] %v1266_v45  }
 0x1ad   : > { %1299 = vst [vmem:[%s943_s25 + $0x10] sm:$0xff] %v1271_v48  }
 0x1ae   : > { %1300 = vst [vmem:[%s943_s25 + $0x18] sm:$0xff] %v1276_v51  }
 0x1af   : > { %1301 = vst [vmem:[%s943_s25 + $0x20] sm:$0xff] %v1281_v54  }
 0x1b0   : > { %1302 = vst [vmem:[%s943_s25 + $0x28] sm:$0xff] %v1286_v55  }
 0x1b1   : > { %1303 = vst [vmem:[%s943_s25 + $0x30] sm:$0xff] %v1291_v56  }
 0x1b2   : > { %1304 = vst [vmem:[%s943_s25 + $0x38] sm:$0xff] %v1296_v57  }
 0x1b3 PF: > { %p1225_p12 = scmp.ne.s32.totalorder %s1361_s18, 2 }
 0x1b5   : > { %963 = sbr.rel (%p1225_p12) target bundleno = 602 (0x25a), region = 72 }
 0x1ba   : > { %966 = vmatpush.msra.mxu0 %v887_v33  ;;  %v965_v58 = vld [vmem:[%s1578_s4] sm:$0xff] }
 0x1bb   : > { %v964_v59 = vld [vmem:[%s1579_s5] sm:$0xff] }
 0x1bc   : > { %967 = vmatpush.msra.mxu0 %v885_v31 }
 0x1be   : > { %968 = vmatpush.msra.mxu0 %v882_v27 }
 0x1c0   : > { %969 = vmatpush.msra.mxu0 %v1523_v23 }
 0x1c2   : > { %970 = vmatpush.msra.mxu0 %v1519_v19 }
 0x1c4   : > { %971 = vmatpush.msra.mxu0 %v1515_v15 }
 0x1c6   : > { %972 = vmatpush.msra.mxu0 %v1511_v11 }
 0x1c8   : > { %973 = vmatpush.msra.mxu0 %v1507_v7 }
 0x1ca   : > { %974 = vmatpush.msra.mxu0 %v867_v29 }
 0x1cc   : > { %975 = vmatpush.msra.mxu0 %v1525_v25 }
 0x1ce   : > { %976 = vmatpush.msra.mxu0 %v1521_v21 }
 0x1d0   : > { %977 = vmatpush.msra.mxu0 %v1517_v17 }
 0x1d2   : > { %978 = vmatpush.msra.mxu0 %v1513_v13 }
 0x1d4   : > { %979 = vmatpush.msra.mxu0 %v1509_v9 }
 0x1d6   : > { %980 = vmatpush.msra.mxu0 %v1505_v5 }
 0x1d8   : > { %981 = vmatpush.msra.mxu0 %v1503_v3 }
 0x1d9   : > { %982 = vmatmul.f32.vlgmr.msra.gmra.mxu0 %v965_v58 }
 0x256   : > { %v983_v60 = vpop.f32.mrf.mxu0 }
 0x257   : > { %v986_v61 = vadd.f32 %v983_v60, %v964_v59 }
 0x259   : > { %987 = vst [vmem:[%s1579_s5] sm:$0xff] %v986_v61 }
 0x25a PF: > { %s15_s20 = sadd.s32 1, %s1369_s20   ;;  %s1580_s18 = smov %s1365_s19 }
 0x25b   : > { %p12_p13 = scmp.ge.s32.totalorder %s15_s20, 5   ;;  %s1581_s19 = smov %s1583_s21 }
 0x25d   :  { %14 = sbr.rel (!%p12_p13) target bundleno = 2 (0x2), region = 115 }

</bundles_post_ra>
